<compile_context>
chip_gen: v7x
topology: tpu7x:2x2x1
jax: 0.10.0
libtpu: 0.0.40
codegen_flags: <defaults>
</compile_context>

<pallas_src>
import functools

import jax
import jax.numpy as jnp
from jax.experimental import pallas as pl
from jax.experimental.pallas import tpu as pltpu


def _round_up(n, m):
    return ((n + m - 1) // m) * m


def mlp_kernel(x_ref,
               w1_ref, b1_ref,
               w2_ref, b2_ref,
               w3_ref, b3_ref,
               w4_ref, b4_ref,
               w5_ref, b5_ref,
               w6_ref, b6_ref,
               o_ref,
               *, use_bf16):
    x = x_ref[...]

    def linear_relu(h, w_ref, b_ref, relu=True):
        w = w_ref[...]
        if use_bf16:
            h = h.astype(jnp.bfloat16)
            w = w.astype(jnp.bfloat16)
        y = jnp.dot(h, w, preferred_element_type=jnp.float32)
        y = y + b_ref[...]              # (1, out) broadcasts over batch rows
        if relu:
            y = jnp.maximum(y, 0.0)
        return y

    h = linear_relu(x, w1_ref, b1_ref)           # (TB, 64)
    h = linear_relu(h, w2_ref, b2_ref)           # (TB, 128)
    h = linear_relu(h, w3_ref, b3_ref)           # (TB, 64)
    h = linear_relu(h, w4_ref, b4_ref)           # (TB, 32)
    h = linear_relu(h, w5_ref, b5_ref)           # (TB, 16)

    # Final 16 -> 1 layer off the MXU: broadcast multiply (VPU) + lane
    # reduce (XLU). w6 is passed as a (1, 16) row, b6 as (1, 1).
    y = jnp.sum(h * w6_ref[...], axis=-1, keepdims=True) + b6_ref[...]  # (TB, 1)

    o_ref[...] = y.astype(o_ref.dtype)


def regression_model_forward(x, params, *, block_batch=1024, use_bf16=False):
    """x: (B, input_size) float32. params: list of (W, b) with W (in, out)."""
    x = x.astype(jnp.float32)
    B, in_features = x.shape

    # Batch tile: multiple of 8 (sublane), capped so small batches aren't
    # wastefully padded. Fits trivially in scoped VMEM on v5e/v6e/v7x.
    TB = min(block_batch, _round_up(max(B, 1), 8))
    TB = _round_up(TB, 8)

    # Pad the batch so every grid step sees a full (TB, in) tile.
    B_pad = _round_up(B, TB)
    if B_pad != B:
        x = jnp.pad(x, ((0, B_pad - B), (0, 0)))

    grid = (B_pad // TB,)

    flat_args = [x]
    in_specs = [pl.BlockSpec((TB, in_features), lambda i: (i, 0))]

    n_layers = len(params)
    for li, (w, b) in enumerate(params):
        if li == n_layers - 1:
            # Last (16 -> 1) layer: pass the weight as a (1, 16) row so the
            # kernel uses VPU multiply + lane reduce instead of an MXU pass.
            w = w.reshape(1, -1)
        b2 = b.reshape(1, -1)
        flat_args.extend([w, b2])
        # Constant block index: weights/biases stay VMEM-resident across all
        # batch tiles (no re-DMA per grid step).
        in_specs.append(pl.BlockSpec(w.shape, lambda i: (0, 0)))
        in_specs.append(pl.BlockSpec(b2.shape, lambda i: (0, 0)))

    out_shape = jax.ShapeDtypeStruct((B_pad, 1), jnp.float32)

    out = pl.pallas_call(
        functools.partial(mlp_kernel, use_bf16=use_bf16),
        out_shape=out_shape,
        grid=grid,
        in_specs=in_specs,
        out_specs=pl.BlockSpec((TB, 1), lambda i: (i, 0)),
        compiler_params=pltpu.CompilerParams(
            dimension_semantics=("parallel",),
        ),
    )(*flat_args)

    return out[:B]


def init_params(key, input_size):
    """Deterministic init mimicking PyTorch nn.Linear default (uniform +-1/sqrt(fan_in)).
    Weights stored transposed relative to torch: shape (in, out)."""
    dims = [input_size, 64, 128, 64, 32, 16, 1]
    params = []
    for i in range(len(dims) - 1):
        fan_in, fan_out = dims[i], dims[i + 1]
        key, kw, kb = jax.random.split(key, 3)
        bound = 1.0 / jnp.sqrt(fan_in)
        w = jax.random.uniform(kw, (fan_in, fan_out), jnp.float32, -bound, bound)
        b = jax.random.uniform(kb, (fan_out,), jnp.float32, -bound, bound)
        params.append((w, b))
    return params


def reference_forward(x, params):
    h = x
    for i, (w, b) in enumerate(params):
        h = h @ w + b
        if i < len(params) - 1:
            h = jnp.maximum(h, 0.0)
    return h


if __name__ == "__main__":
    key = jax.random.PRNGKey(0)
    batch = 8
    input_size = 8  # stands in for the number of tabular features

    kx, kp = jax.random.split(key)
    x = jax.random.normal(kx, (batch, input_size), jnp.float32)
    params = init_params(kp, input_size)

    ref = reference_forward(x, params)

    # f32 MXU operands (exact semantics of the PyTorch module).
    out = jax.block_until_ready(regression_model_forward(x, params))
    assert out.shape == (batch, 1), out.shape
    assert jnp.allclose(out, ref, atol=1e-4, rtol=1e-4), (
        float(jnp.max(jnp.abs(out - ref))))

    # bf16 MXU operands with f32 accumulation (bf16-native MXU fast path).
    out_bf16 = jax.block_until_ready(
        regression_model_forward(x, params, use_bf16=True))
    assert out_bf16.shape == (batch, 1), out_bf16.shape
    assert jnp.allclose(out_bf16, ref, atol=5e-2, rtol=5e-2), (
        float(jnp.max(jnp.abs(out_bf16 - ref))))

    # Ragged batch: not a multiple of the tile size -> exercises pad + slice.
    batch2 = 21
    x2 = jax.random.normal(jax.random.PRNGKey(1), (batch2, input_size), jnp.float32)
    ref2 = reference_forward(x2, params)
    out2 = jax.block_until_ready(
        regression_model_forward(x2, params, block_batch=16))
    assert out2.shape == (batch2, 1), out2.shape
    assert jnp.allclose(out2, ref2, atol=1e-4, rtol=1e-4), (
        float(jnp.max(jnp.abs(out2 - ref2))))

    print("KERNEL_OK")
</pallas_src>

<mosaic_0001>
module attributes {stable_mosaic.version = 11 : i64} {
  func.func @mlp_kernel(%arg0: i32, %arg1: memref<8x8xf32, #tpu.memory_space<vmem>>, %arg2: memref<8x64xf32, #tpu.memory_space<vmem>>, %arg3: memref<1x64xf32, #tpu.memory_space<vmem>>, %arg4: memref<64x128xf32, #tpu.memory_space<vmem>>, %arg5: memref<1x128xf32, #tpu.memory_space<vmem>>, %arg6: memref<128x64xf32, #tpu.memory_space<vmem>>, %arg7: memref<1x64xf32, #tpu.memory_space<vmem>>, %arg8: memref<64x32xf32, #tpu.memory_space<vmem>>, %arg9: memref<1x32xf32, #tpu.memory_space<vmem>>, %arg10: memref<32x16xf32, #tpu.memory_space<vmem>>, %arg11: memref<1x16xf32, #tpu.memory_space<vmem>>, %arg12: memref<1x16xf32, #tpu.memory_space<vmem>>, %arg13: memref<1x1xf32, #tpu.memory_space<vmem>>, %arg14: memref<8x1xf32, #tpu.memory_space<vmem>>) attributes {dimension_semantics = [#tpu.dimension_semantics<parallel>], iteration_bounds = array<i64: 1>, scalar_prefetch = 0 : i64, scratch_operands = 0 : i64, tpu.core_type = #tpu.core_type<tc>, window_params = [{transform_indices = @transform_0, window_bounds = array<i64: 8, 8>}, {pipeline_mode = #tpu.pipeline_mode<synchronous>, transform_indices = @transform_1, window_bounds = array<i64: 8, 64>}, {pipeline_mode = #tpu.pipeline_mode<synchronous>, transform_indices = @transform_2, window_bounds = array<i64: 1, 64>}, {pipeline_mode = #tpu.pipeline_mode<synchronous>, transform_indices = @transform_3, window_bounds = array<i64: 64, 128>}, {pipeline_mode = #tpu.pipeline_mode<synchronous>, transform_indices = @transform_4, window_bounds = array<i64: 1, 128>}, {pipeline_mode = #tpu.pipeline_mode<synchronous>, transform_indices = @transform_5, window_bounds = array<i64: 128, 64>}, {pipeline_mode = #tpu.pipeline_mode<synchronous>, transform_indices = @transform_6, window_bounds = array<i64: 1, 64>}, {pipeline_mode = #tpu.pipeline_mode<synchronous>, transform_indices = @transform_7, window_bounds = array<i64: 64, 32>}, {pipeline_mode = #tpu.pipeline_mode<synchronous>, transform_indices = @transform_8, window_bounds = array<i64: 1, 32>}, {pipeline_mode = #tpu.pipeline_mode<synchronous>, transform_indices = @transform_9, window_bounds = array<i64: 32, 16>}, {pipeline_mode = #tpu.pipeline_mode<synchronous>, transform_indices = @transform_10, window_bounds = array<i64: 1, 16>}, {pipeline_mode = #tpu.pipeline_mode<synchronous>, transform_indices = @transform_11, window_bounds = array<i64: 1, 16>}, {pipeline_mode = #tpu.pipeline_mode<synchronous>, transform_indices = @transform_12, window_bounds = array<i64: 1, 1>}, {transform_indices = @transform_13, window_bounds = array<i64: 8, 1>}]} {
    %c0 = arith.constant 0 : index
    %c0_0 = arith.constant 0 : index
    %0 = vector.load %arg1[%c0, %c0_0] : memref<8x8xf32, #tpu.memory_space<vmem>>, vector<8x8xf32>
    %c0_1 = arith.constant 0 : index
    %c0_2 = arith.constant 0 : index
    %1 = vector.load %arg2[%c0_1, %c0_2] : memref<8x64xf32, #tpu.memory_space<vmem>>, vector<8x64xf32>
    %cst = arith.constant dense<0.000000e+00> : vector<8x64xf32>
    %2 = tpu.matmul %0, %1, %cst {dimension_numbers = #tpu.dot_dimension_numbers<[1], [0], [0], [1], [0, 0, 1, 1], [], []>} : vector<8x8xf32>, vector<8x64xf32>, vector<8x64xf32> -> vector<8x64xf32>
    %c0_3 = arith.constant 0 : index
    %c0_4 = arith.constant 0 : index
    %3 = vector.load %arg3[%c0_3, %c0_4] : memref<1x64xf32, #tpu.memory_space<vmem>>, vector<1x64xf32>
    %4 = vector.broadcast %3 : vector<1x64xf32> to vector<8x64xf32>
    %5 = arith.addf %2, %4 : vector<8x64xf32>
    %cst_5 = arith.constant 0.000000e+00 : f32
    %6 = vector.broadcast %cst_5 : f32 to vector<8x64xf32>
    %7 = arith.maximumf %5, %6 : vector<8x64xf32>
    %c0_6 = arith.constant 0 : index
    %c0_7 = arith.constant 0 : index
    %8 = vector.load %arg4[%c0_6, %c0_7] : memref<64x128xf32, #tpu.memory_space<vmem>>, vector<64x128xf32>
    %cst_8 = arith.constant dense<0.000000e+00> : vector<8x128xf32>
    %9 = tpu.matmul %7, %8, %cst_8 {dimension_numbers = #tpu.dot_dimension_numbers<[1], [0], [0], [1], [0, 0, 1, 1], [], []>} : vector<8x64xf32>, vector<64x128xf32>, vector<8x128xf32> -> vector<8x128xf32>
    %c0_9 = arith.constant 0 : index
    %c0_10 = arith.constant 0 : index
    %10 = vector.load %arg5[%c0_9, %c0_10] : memref<1x128xf32, #tpu.memory_space<vmem>>, vector<1x128xf32>
    %11 = vector.broadcast %10 : vector<1x128xf32> to vector<8x128xf32>
    %12 = arith.addf %9, %11 : vector<8x128xf32>
    %cst_11 = arith.constant 0.000000e+00 : f32
    %13 = vector.broadcast %cst_11 : f32 to vector<8x128xf32>
    %14 = arith.maximumf %12, %13 : vector<8x128xf32>
    %c0_12 = arith.constant 0 : index
    %c0_13 = arith.constant 0 : index
    %15 = vector.load %arg6[%c0_12, %c0_13] : memref<128x64xf32, #tpu.memory_space<vmem>>, vector<128x64xf32>
    %cst_14 = arith.constant dense<0.000000e+00> : vector<8x64xf32>
    %16 = tpu.matmul %14, %15, %cst_14 {dimension_numbers = #tpu.dot_dimension_numbers<[1], [0], [0], [1], [0, 0, 1, 1], [], []>} : vector<8x128xf32>, vector<128x64xf32>, vector<8x64xf32> -> vector<8x64xf32>
    %c0_15 = arith.constant 0 : index
    %c0_16 = arith.constant 0 : index
    %17 = vector.load %arg7[%c0_15, %c0_16] : memref<1x64xf32, #tpu.memory_space<vmem>>, vector<1x64xf32>
    %18 = vector.broadcast %17 : vector<1x64xf32> to vector<8x64xf32>
    %19 = arith.addf %16, %18 : vector<8x64xf32>
    %cst_17 = arith.constant 0.000000e+00 : f32
    %20 = vector.broadcast %cst_17 : f32 to vector<8x64xf32>
    %21 = arith.maximumf %19, %20 : vector<8x64xf32>
    %c0_18 = arith.constant 0 : index
    %c0_19 = arith.constant 0 : index
    %22 = vector.load %arg8[%c0_18, %c0_19] : memref<64x32xf32, #tpu.memory_space<vmem>>, vector<64x32xf32>
    %cst_20 = arith.constant dense<0.000000e+00> : vector<8x32xf32>
    %23 = tpu.matmul %21, %22, %cst_20 {dimension_numbers = #tpu.dot_dimension_numbers<[1], [0], [0], [1], [0, 0, 1, 1], [], []>} : vector<8x64xf32>, vector<64x32xf32>, vector<8x32xf32> -> vector<8x32xf32>
    %c0_21 = arith.constant 0 : index
    %c0_22 = arith.constant 0 : index
    %24 = vector.load %arg9[%c0_21, %c0_22] : memref<1x32xf32, #tpu.memory_space<vmem>>, vector<1x32xf32>
    %25 = vector.broadcast %24 : vector<1x32xf32> to vector<8x32xf32>
    %26 = arith.addf %23, %25 : vector<8x32xf32>
    %cst_23 = arith.constant 0.000000e+00 : f32
    %27 = vector.broadcast %cst_23 : f32 to vector<8x32xf32>
    %28 = arith.maximumf %26, %27 : vector<8x32xf32>
    %c0_24 = arith.constant 0 : index
    %c0_25 = arith.constant 0 : index
    %29 = vector.load %arg10[%c0_24, %c0_25] : memref<32x16xf32, #tpu.memory_space<vmem>>, vector<32x16xf32>
    %cst_26 = arith.constant dense<0.000000e+00> : vector<8x16xf32>
    %30 = tpu.matmul %28, %29, %cst_26 {dimension_numbers = #tpu.dot_dimension_numbers<[1], [0], [0], [1], [0, 0, 1, 1], [], []>} : vector<8x32xf32>, vector<32x16xf32>, vector<8x16xf32> -> vector<8x16xf32>
    %c0_27 = arith.constant 0 : index
    %c0_28 = arith.constant 0 : index
    %31 = vector.load %arg11[%c0_27, %c0_28] : memref<1x16xf32, #tpu.memory_space<vmem>>, vector<1x16xf32>
    %32 = vector.broadcast %31 : vector<1x16xf32> to vector<8x16xf32>
    %33 = arith.addf %30, %32 : vector<8x16xf32>
    %cst_29 = arith.constant 0.000000e+00 : f32
    %34 = vector.broadcast %cst_29 : f32 to vector<8x16xf32>
    %35 = arith.maximumf %33, %34 : vector<8x16xf32>
    %c0_30 = arith.constant 0 : index
    %c0_31 = arith.constant 0 : index
    %36 = vector.load %arg12[%c0_30, %c0_31] : memref<1x16xf32, #tpu.memory_space<vmem>>, vector<1x16xf32>
    %37 = vector.broadcast %36 : vector<1x16xf32> to vector<8x16xf32>
    %38 = arith.mulf %35, %37 : vector<8x16xf32>
    %cst_32 = arith.constant dense<0.000000e+00> : vector<8xf32>
    %39 = vector.multi_reduction <add>, %38, %cst_32 [1] : vector<8x16xf32> to vector<8xf32>
    %40 = vector.shape_cast %39 : vector<8xf32> to vector<8x1xf32>
    %c0_33 = arith.constant 0 : index
    %c0_34 = arith.constant 0 : index
    %41 = vector.load %arg13[%c0_33, %c0_34] : memref<1x1xf32, #tpu.memory_space<vmem>>, vector<1x1xf32>
    %42 = vector.broadcast %41 : vector<1x1xf32> to vector<8x1xf32>
    %43 = arith.addf %40, %42 : vector<8x1xf32>
    %c0_35 = arith.constant 0 : index
    %c0_36 = arith.constant 0 : index
    %44 = vector.load %arg14[%c0_35, %c0_36] : memref<8x1xf32, #tpu.memory_space<vmem>>, vector<8x1xf32>
    tpu.vector_store %arg14[%c0_35, %c0_36], %43 {strides = array<i32>} : memref<8x1xf32, #tpu.memory_space<vmem>>, vector<8x1xf32>,
    return
  }
  func.func @transform_0(%arg0: i32) -> (i32, i32) {
    %c0_i32 = arith.constant 0 : i32
    %c0_i32_0 = arith.constant 0 : i32
    return %arg0, %c0_i32 : i32, i32
  }
  func.func @transform_1(%arg0: i32) -> (i32, i32) {
    %c0_i32 = arith.constant 0 : i32
    %c0_i32_0 = arith.constant 0 : i32
    %c0_i32_1 = arith.constant 0 : i32
    return %c0_i32, %c0_i32_0 : i32, i32
  }
  func.func @transform_2(%arg0: i32) -> (i32, i32) {
    %c0_i32 = arith.constant 0 : i32
    %c0_i32_0 = arith.constant 0 : i32
    %c0_i32_1 = arith.constant 0 : i32
    return %c0_i32, %c0_i32_0 : i32, i32
  }
  func.func @transform_3(%arg0: i32) -> (i32, i32) {
    %c0_i32 = arith.constant 0 : i32
    %c0_i32_0 = arith.constant 0 : i32
    %c0_i32_1 = arith.constant 0 : i32
    return %c0_i32, %c0_i32_0 : i32, i32
  }
  func.func @transform_4(%arg0: i32) -> (i32, i32) {
    %c0_i32 = arith.constant 0 : i32
    %c0_i32_0 = arith.constant 0 : i32
    %c0_i32_1 = arith.constant 0 : i32
    return %c0_i32, %c0_i32_0 : i32, i32
  }
  func.func @transform_5(%arg0: i32) -> (i32, i32) {
    %c0_i32 = arith.constant 0 : i32
    %c0_i32_0 = arith.constant 0 : i32
    %c0_i32_1 = arith.constant 0 : i32
    return %c0_i32, %c0_i32_0 : i32, i32
  }
  func.func @transform_6(%arg0: i32) -> (i32, i32) {
    %c0_i32 = arith.constant 0 : i32
    %c0_i32_0 = arith.constant 0 : i32
    %c0_i32_1 = arith.constant 0 : i32
    return %c0_i32, %c0_i32_0 : i32, i32
  }
  func.func @transform_7(%arg0: i32) -> (i32, i32) {
    %c0_i32 = arith.constant 0 : i32
    %c0_i32_0 = arith.constant 0 : i32
    %c0_i32_1 = arith.constant 0 : i32
    return %c0_i32, %c0_i32_0 : i32, i32
  }
  func.func @transform_8(%arg0: i32) -> (i32, i32) {
    %c0_i32 = arith.constant 0 : i32
    %c0_i32_0 = arith.constant 0 : i32
    %c0_i32_1 = arith.constant 0 : i32
    return %c0_i32, %c0_i32_0 : i32, i32
  }
  func.func @transform_9(%arg0: i32) -> (i32, i32) {
    %c0_i32 = arith.constant 0 : i32
    %c0_i32_0 = arith.constant 0 : i32
    %c0_i32_1 = arith.constant 0 : i32
    return %c0_i32, %c0_i32_0 : i32, i32
  }
  func.func @transform_10(%arg0: i32) -> (i32, i32) {
    %c0_i32 = arith.constant 0 : i32
    %c0_i32_0 = arith.constant 0 : i32
    %c0_i32_1 = arith.constant 0 : i32
    return %c0_i32, %c0_i32_0 : i32, i32
  }
  func.func @transform_11(%arg0: i32) -> (i32, i32) {
    %c0_i32 = arith.constant 0 : i32
    %c0_i32_0 = arith.constant 0 : i32
    %c0_i32_1 = arith.constant 0 : i32
    return %c0_i32, %c0_i32_0 : i32, i32
  }
  func.func @transform_12(%arg0: i32) -> (i32, i32) {
    %c0_i32 = arith.constant 0 : i32
    %c0_i32_0 = arith.constant 0 : i32
    %c0_i32_1 = arith.constant 0 : i32
    return %c0_i32, %c0_i32_0 : i32, i32
  }
  func.func @transform_13(%arg0: i32) -> (i32, i32) {
    %c0_i32 = arith.constant 0 : i32
    %c0_i32_0 = arith.constant 0 : i32
    return %arg0, %c0_i32 : i32, i32
  }
}

</mosaic_0001>

<bundles_post_ra>
// kernel: tpu_custom_call.1
= control target key start
LH: loop header
LB: loop body
LE: loop exit
PB: predicated region body
PF: predicated region fallthrough
CT: control target
= control target key end

     0   :  { %vm55_vm0 = vcmask 64512   ;;  %v714_v0 = vmov 0.0   ;;  %vm715_vm1 = vmmov 0   ;;  %v716_v4 = vmov 0.0|0.0   ;;  %s956_s1 = inlined_call_operand.vmem [shape: f32[8,64], index: 1, kind: input, shape index: {}]   ;;  %s957_s0 = inlined_call_operand.vmem [shape: f32[8,8], index: 0, kind: input, shape index: {}]   ;;  %s958_s3 = inlined_call_operand.vmem [shape: f32[64,128], index: 3, kind: input, shape index: {}]   ;;  %s959_s5 = inlined_call_operand.vmem [shape: f32[128,64], index: 5, kind: input, shape index: {}]   ;;  %s960_s2 = inlined_call_operand.vmem [shape: f32[1,64], index: 2, kind: input, shape index: {}]   ;;  %s961_s7 = inlined_call_operand.vmem [shape: f32[64,32], index: 7, kind: input, shape index: {}]   ;;  %s962_s4 = inlined_call_operand.vmem [shape: f32[1,128], index: 4, kind: input, shape index: {}]   ;;  %s963_s6 = inlined_call_operand.vmem [shape: f32[1,64], index: 6, kind: input, shape index: {}]   ;;  %s964_s9 = inlined_call_operand.vmem [shape: f32[32,16], index: 9, kind: input, shape index: {}]   ;;  %s965_s8 = inlined_call_operand.vmem [shape: f32[1,32], index: 8, kind: input, shape index: {}]   ;;  %s966_s12 = inlined_call_operand.<no memory space> [shape: f32[1,1], index: 12, kind: input, shape index: {}]   ;;  %s967_s10 = inlined_call_operand.vmem [shape: f32[1,16], index: 10, kind: input, shape index: {}]   ;;  %s968_s11 = inlined_call_operand.vmem [shape: f32[1,16], index: 11, kind: input, shape index: {}]   ;;  %s969_s13 = inlined_call_operand.vmem [shape: f32[8,1], index: 13, kind: output, shape index: {}]  }
   0x1   :  { %568 = vmatprep.subr.mxu0 %v714_v0  ;;  %v47_v1 = vld [vmem:[%s956_s1] sm:$0xff]  ;;  %570 = vmatprep.mubr.msk.f32.mxu0 %vm715_vm1, %v714_v0  ;;  %v131_v5 = vld [vmem:[%s958_s3 + $0x8] sm:$0xff]  ;;  %v132_v6 = vld [vmem:[%s958_s3 + $0x10] sm:$0xff]  ;;  %vm145_vm2 = vcmask 523264   ;;  %vm414_vm3 = vcmask 261120   ;;  %vm497_vm4 = vcmask 130048  }
   0x2   :  { %v46_v2 = vld [vmem:[%s957_s0] sm:$0xff]  ;;  %569 = vmatpush3.msra.mxu0 %v47_v1  ;;  %657 = vmatprep.subr.bf16.mxu1 %v716_v4  ;;  %v133_v7 = vld [vmem:[%s958_s3 + $0x18] sm:$0xff]  ;;  %v135_v11 = vld [vmem:[%s958_s3 + $0x28] sm:$0xff]  ;;  %vm509_vm5 = vcmask 7168  }
   0x3   :  { %v130_v3 = vld [vmem:[%s958_s3] sm:$0xff]  ;;  %571 = vmatmul.mubr.msk.f32.vlgmr.msra.gmra.mrb[0].mxu0 %vm55_vm0, %v46_v2  ;;  %589 = vmatprep.mubr.msk.f32.mxu1 %vm715_vm1, %v714_v0  ;;  %v661_v9 = vpack.c.bf16 %v133_v7, %v132_v6  ;;  %v136_v13 = vld [vmem:[%s958_s3 + $0x30] sm:$0xff]  ;;  %v137_v14 = vld [vmem:[%s958_s3 + $0x38] sm:$0xff] }
   0x4   :  { %v658_v8 = vpack.c.bf16 %v131_v5, %v130_v3  ;;  %669 = vmatprep.subr.bf16.mxu0 %v716_v4  ;;  %624 = vmatprep.mubr.msk.f32.mxu0 %vm715_vm1, %v714_v0  ;;  %v134_v10 = vld [vmem:[%s958_s3 + $0x20] sm:$0xff]  ;;  %v667_v15 = vpack.c.bf16 %v137_v14, %v136_v13  ;;  %v221_v17 = vld [vmem:[%s959_s5 + $0x8] sm:$0xff]  ;;  %v222_v18 = vld [vmem:[%s959_s5 + $0x10] sm:$0xff] }
   0x5   :  { %v664_v12 = vpack.c.bf16 %v135_v11, %v134_v10  ;;  %v220_v16 = vld [vmem:[%s959_s5] sm:$0xff]  ;;  %v223_v20 = vld [vmem:[%s959_s5 + $0x18] sm:$0xff]  ;;  %v225_v23 = vld [vmem:[%s959_s5 + $0x28] sm:$0xff] }
   0x6   :  { %659 = vmatpush3.bf16.msra.mxu1 %v658_v8  ;;  %v670_v19 = vpack.c.bf16 %v221_v17, %v220_v16  ;;  %v673_v21 = vpack.c.bf16 %v223_v20, %v222_v18  ;;  %v224_v22 = vld [vmem:[%s959_s5 + $0x20] sm:$0xff]  ;;  %v226_v25 = vld [vmem:[%s959_s5 + $0x30] sm:$0xff]  ;;  %v227_v26 = vld [vmem:[%s959_s5 + $0x38] sm:$0xff] }
   0x7   :  { %660 = vmatprep.subr.bf16.mxu1 %v716_v4  ;;  %v676_v24 = vpack.c.bf16 %v225_v23, %v224_v22  ;;  %v679_v27 = vpack.c.bf16 %v227_v26, %v226_v25  ;;  %v228_v28 = vld [vmem:[%s959_s5 + $0x40] sm:$0xff]  ;;  %v229_v29 = vld [vmem:[%s959_s5 + $0x48] sm:$0xff]  ;;  %v230_v31 = vld [vmem:[%s959_s5 + $0x50] sm:$0xff] }
   0x8   :  { %671 = vmatpush3.bf16.msra.mxu0 %v670_v19  ;;  %v682_v30 = vpack.c.bf16 %v229_v29, %v228_v28  ;;  %v231_v32 = vld [vmem:[%s959_s5 + $0x58] sm:$0xff]  ;;  %v232_v34 = vld [vmem:[%s959_s5 + $0x60] sm:$0xff]  ;;  %v233_v35 = vld [vmem:[%s959_s5 + $0x68] sm:$0xff] }
   0x9   :  { %672 = vmatprep.subr.bf16.mxu0 %v716_v4  ;;  %v685_v33 = vpack.c.bf16 %v231_v32, %v230_v31  ;;  %v688_v36 = vpack.c.bf16 %v233_v35, %v232_v34  ;;  %v515_v37 = vld [vmem:[%s960_s2] ss:$0 sm:$0xff]  ;;  %v234_v42 = vld [vmem:[%s959_s5 + $0x70] sm:$0xff]  ;;  %v235_v43 = vld [vmem:[%s959_s5 + $0x78] sm:$0xff] }
   0xa   :  { %662 = vmatpush3.bf16.msra.mxu1 %v661_v9  ;;  %v691_v44 = vpack.c.bf16 %v235_v43, %v234_v42  ;;  %v314_v45 = vld [vmem:[%s961_s7] sm:$0xff]  ;;  %v315_v46 = vld [vmem:[%s961_s7 + $0x8] sm:$0xff]  ;;  %v316_v47 = vld [vmem:[%s961_s7 + $0x10] sm:$0xff] }
   0xb   :  { %663 = vmatprep.subr.bf16.mxu1 %v716_v4  ;;  %v694_v48 = vpack.c.bf16 %v315_v46, %v314_v45  ;;  %v317_v49 = vld [vmem:[%s961_s7 + $0x18] sm:$0xff]  ;;  %v318_v51 = vld [vmem:[%s961_s7 + $0x20] sm:$0xff]  ;;  %v319_v52 = vld [vmem:[%s961_s7 + $0x28] sm:$0xff] }
   0xc   :  { %674 = vmatpush3.bf16.msra.mxu0 %v673_v21  ;;  %v697_v50 = vpack.c.bf16 %v317_v49, %v316_v47  ;;  %v700_v53 = vpack.c.bf16 %v319_v52, %v318_v51  ;;  %v517_v54 = vld [vmem:[%s962_s4] ss:$0 sm:$0xff]  ;;  %v320_v59 = vld [vmem:[%s961_s7 + $0x30] sm:$0xff]  ;;  %v321_v60 = vld [vmem:[%s961_s7 + $0x38] sm:$0xff] }
   0xd   :  { %675 = vmatprep.subr.bf16.mxu0 %v716_v4  ;;  %v703_v61 = vpack.c.bf16 %v321_v60, %v320_v59  ;;  %v519_v62 = vld [vmem:[%s963_s6] ss:$0 sm:$0xff]  ;;  %v404_v1 = vld [vmem:[%s964_s9 + $0x8] sm:$0xff]  ;;  %v405_v8 = vld [vmem:[%s964_s9 + $0x10] sm:$0xff] }
   0xe   :  { %665 = vmatpush3.bf16.msra.mxu1 %v664_v12  ;;  %v403_v63 = vld [vmem:[%s964_s9] sm:$0xff]  ;;  %v406_v9 = vld [vmem:[%s964_s9 + $0x18] sm:$0xff] }
   0xf   :  { %666 = vmatprep.subr.bf16.mxu1 %v716_v4  ;;  %v706_v6 = vpack.c.bf16 %v404_v1, %v403_v63  ;;  %v709_v10 = vpack.c.bf16 %v406_v9, %v405_v8  ;;  %v520_v11 = vld [vmem:[%s965_s8] ss:$0 sm:$0xff] }
  0x10   :  { %677 = vmatpush3.bf16.msra.mxu0 %v676_v24  ;;  %v524_v19 = vld [vmem:[%s968_s11] ss:$0 sm:$0xff] }
  0x11   :  { %678 = vmatprep.subr.bf16.mxu0 %v716_v4 }
  0x12   :  { %668 = vmatpush3.bf16.msra.mxu1 %v667_v15  ;;  %v522_v15 = vld [vmem:[%s967_s10] ss:$0 sm:$0xff] }
  0x13   :  { %693 = vmatprep.subr.bf16.mxu1 %v716_v4 }
  0x14   :  { %680 = vmatpush3.bf16.msra.mxu0 %v679_v27 }
  0x15   :  { %681 = vmatprep.subr.bf16.mxu0 %v716_v4 }
  0x18   :  { %683 = vmatpush3.bf16.msra.mxu0 %v682_v30 }
  0x19   :  { %684 = vmatprep.subr.bf16.mxu0 %v716_v4 }
  0x1c   :  { %686 = vmatpush3.bf16.msra.mxu0 %v685_v33 }
  0x1d   :  { %687 = vmatprep.subr.bf16.mxu0 %v716_v4 }
  0x20   :  { %689 = vmatpush3.bf16.msra.mxu0 %v688_v36 }
  0x21   :  { %690 = vmatprep.subr.bf16.mxu0 %v716_v4 }
  0x24   :  { %692 = vmatpush3.bf16.msra.mxu0 %v691_v44 }
  0xd6   :  { %v125_v38 = vpop.f32.mrb[0].mxu0 }
  0xd7   :  { %v126_v39 = vadd.f32 %v515_v37, %v125_v38  ;;  %v572_v40 = vpop.f32.mrb[1].mxu0 }
  0xd9   :  { %v129_v41 = vmax.f32 %v126_v39, 0.0 }
  0xdb   :  { %590 = vmatmul.mubr.msk.f32.vlgmr.msra.gmra.mrb[0].mxu1 %vm145_vm2, %v129_v41 }
  0xdc   :  { %643 = vmatprep.mubr.msk.f32.mxu1 %vm715_vm1, %v714_v0  ;;  %695 = vmatpush3.bf16.msra.mxu1 %v694_v48 }
  0xdd   :  { %696 = vmatprep.subr.bf16.mxu1 %v716_v4 }
  0xe0   :  { %698 = vmatpush3.bf16.msra.mxu1 %v697_v50 }
  0xe1   :  { %699 = vmatprep.subr.bf16.mxu1 %v716_v4 }
  0xe4   :  { %701 = vmatpush3.bf16.msra.mxu1 %v700_v53 }
  0xe5   :  { %702 = vmatprep.subr.bf16.mxu1 %v716_v4 }
  0xe8   :  { %704 = vmatpush3.bf16.msra.mxu1 %v703_v61 }
  0xe9   :  { %705 = vmatprep.subr.bf16.mxu1 %v716_v4 }
 0x1ae   :  { %v215_v55 = vpop.f32.mrb[0].mxu1 }
 0x1af   :  { %v216_v56 = vadd.f32 %v517_v54, %v215_v55  ;;  %v591_v57 = vpop.f32.mrb[1].mxu1 }
 0x1b1   :  { %v219_v58 = vmax.f32 %v216_v56, 0.0 }
 0x1b3   :  { %625 = vmatmul.mubr.f32.vlgmr.msra.gmra.mrb[2].mxu0 %v219_v58 }
 0x286   :  { %v309_v2 = vpop.f32.mrb[2].mxu0 }
 0x287   :  { %v310_v3 = vadd.f32 %v519_v62, %v309_v2  ;;  %v626_v5 = vpop.f32.mrb[3].mxu0 }
 0x289   :  { %v313_v7 = vmax.f32 %v310_v3, 0.0 }
 0x28b   :  { %644 = vmatmul.mubr.msk.f32.vlgmr.msra.gmra.mrb[2].mxu1 %vm145_vm2, %v313_v7 }
 0x28c   :  { %707 = vmatpush3.bf16.msra.mxu1 %v706_v6  ;;  %654 = vmatprep.mubr.msk.f32.mxu1 %vm715_vm1, %v714_v0 }
 0x28d   :  { %708 = vmatprep.subr.bf16.mxu1 %v716_v4  ;;  %v18_v4 = vstv %s966_s12 }
 0x28e   :  { %19 = vst [vmem:[#allocation2] sm:$0x1] %v18_v4 }
 0x290   :  { %710 = vmatpush3.bf16.msra.mxu1 %v709_v10 }
 0x295   :  { %v525_v23 = vld [vmem:[#allocation2] ss:$0 sm:$0xff] }
 0x35e   :  { %v398_v12 = vpop.f32.mrb[2].mxu1 }
 0x35f   :  { %v399_v13 = vadd.f32 %v520_v11, %v398_v12  ;;  %v645_v14 = vpop.f32.mrb[3].mxu1 }
 0x361   :  { %v402_v0 = vmax.f32 %v399_v13, 0.0 }
 0x363   :  { %655 = vmatmul.mubr.msk.f32.vlgmr.msra.gmra.mrb[4].mxu1 %vm414_vm3, %v402_v0 }
 0x436   :  { %v484_v16 = vpop.f32.mrb[4].mxu1 }
 0x437   :  { %v485_v17 = vadd.f32 %v522_v15, %v484_v16  ;;  %v656_v18 = vpop.f32.mrb[5].mxu1 }
 0x439   :  { %v488_v20 = vmax.f32 %v485_v17, 0.0 }
 0x43b   :  { %v496_v21 = vmul.f32 %v524_v19, %v488_v20 }
 0x43d   :  { %v498_v22 = vsel %vm497_vm4, %v496_v21, 0.0 }
 0x43e   :  { %499 = vadd.xlane.f32.xlu0 %v498_v22 }
 0x4cb   :  { %v500_v24 = vpop.xlane.xlu0 %499 }
 0x4cc   :  { %v508_v25 = vadd.f32 %v525_v23, %v500_v24 }
 0x4ce   :  { %510 = vst.msk [vmem:[%s969_s13] sm:$0xff] %vm509_vm5, %v508_v25 }

</bundles_post_ra>
